<compile_context>
chip_gen: v7x
topology: tpu7x:2x2x1
jax: 0.10.0
libtpu: 0.0.40
codegen_flags: <defaults>
</compile_context>

<pallas_src>
import functools

import jax
import jax.numpy as jnp
from jax.experimental import pallas as pl
from jax.experimental.pallas import tpu as pltpu


def _round_up(n, m):
    return ((n + m - 1) // m) * m


def qnn_kernel(x_ref, w1_ref, b1_ref, w2_ref, b2_ref, w3_ref, b3_ref, o_ref):
    # x arrives f32; cast to bf16 in-kernel (hidden under MXU / DMA work).
    x = x_ref[...].astype(jnp.bfloat16)
    # Layer 1: Linear (bf16 MXU operands, f32 accumulate) + f32 bias/ReLU.
    h1 = jnp.dot(x, w1_ref[...], preferred_element_type=jnp.float32)
    h1 = jnp.maximum(h1 + b1_ref[...], 0.0)
    # Layer 2.
    h2 = jnp.dot(h1.astype(jnp.bfloat16), w2_ref[...],
                 preferred_element_type=jnp.float32)
    h2 = jnp.maximum(h2 + b2_ref[...], 0.0)
    # Layer 3: Linear, no activation. Store bf16 (halves output writeback).
    out = jnp.dot(h2.astype(jnp.bfloat16), w3_ref[...],
                  preferred_element_type=jnp.float32)
    o_ref[...] = (out + b3_ref[...]).astype(o_ref.dtype)


def prepare_params(w1, b1, w2, b2, w3, b3):
    """One-time prep: pad feature dims to 128 lanes, cast weights to bf16.

    Keeps the per-call path free of tiny pad/convert XLA ops.
    """
    in_dim, hidden = w1.shape
    out_dim = w3.shape[1]
    hp = _round_up(hidden, 128)      # padded hidden width
    op = _round_up(out_dim, 128)     # padded output width (lane-dense store)

    def pad2(a, rows, cols, dtype):
        a = jnp.asarray(a).reshape(-1, a.shape[-1]) if a.ndim == 1 else jnp.asarray(a)
        a = jnp.pad(a, ((0, rows - a.shape[0]), (0, cols - a.shape[1])))
        return a.astype(dtype)

    w1_p = pad2(w1, in_dim, hp, jnp.bfloat16)
    w2_p = pad2(w2, hp, hp, jnp.bfloat16)
    w3_p = pad2(w3, hp, op, jnp.bfloat16)
    b1_p = pad2(b1, 1, hp, jnp.float32)
    b2_p = pad2(b2, 1, hp, jnp.float32)
    b3_p = pad2(b3, 1, op, jnp.float32)
    return w1_p, b1_p, w2_p, b2_p, w3_p, b3_p


@functools.partial(jax.jit,
                   static_argnames=("hidden_dim", "out_dim", "block_m"))
def qnn_forward(x, w1_p, b1_p, w2_p, b2_p, w3_p, b3_p, *,
                hidden_dim, out_dim, block_m=1024):
    """Fused 3-layer MLP forward, gridded over the batch dimension.

    Parameters must come from `prepare_params` (padded, bf16 weights / f32
    biases). Weights stay VMEM-resident across grid steps via a constant
    index_map while activation tiles are software-pipelined.
    """
    batch, in_dim = x.shape
    hp = w1_p.shape[1]
    op = w3_p.shape[1]

    # --- batch tiling -------------------------------------------------------
    tm_cap = _round_up(block_m, 16)
    if batch <= tm_cap:
        # Small batch: single grid step — nothing worth pipelining, and each
        # grid step costs ~0.35 us of fixed overhead.
        tm = _round_up(batch, 16)
    else:
        # Large batch: big tiles, even step count so v7x's two TensorCores
        # both get work (no-op on single-TC v5e/v6e).
        steps = pl.cdiv(batch, tm_cap)
        if steps % 2:
            steps += 1
        tm = _round_up(pl.cdiv(batch, steps), 16)
    grid = (pl.cdiv(batch, tm),)   # Pallas handles the ragged last block.

    resident = lambda shape: pl.BlockSpec(shape, lambda i: (0, 0))

    # Cost estimate on REAL (unpadded) dims.
    flops = 2 * batch * (in_dim * hidden_dim
                         + hidden_dim * hidden_dim
                         + hidden_dim * out_dim)
    bytes_accessed = (
        batch * in_dim * 4                                             # x f32
        + (in_dim * hidden_dim + hidden_dim * hidden_dim
           + hidden_dim * out_dim) * 2                                 # bf16 W
        + (2 * hidden_dim + out_dim) * 4                               # f32 b
        + batch * out_dim * 2                                          # bf16 y
    )

    out_padded = pl.pallas_call(
        qnn_kernel,
        out_shape=jax.ShapeDtypeStruct((batch, op), jnp.bfloat16),
        grid_spec=pltpu.PrefetchScalarGridSpec(
            num_scalar_prefetch=0,
            grid=grid,
            in_specs=[
                pl.BlockSpec((tm, in_dim), lambda i: (i, 0)),  # x tile
                resident((in_dim, hp)),                        # w1
                resident((1, hp)),                             # b1
                resident((hp, hp)),                            # w2
                resident((1, hp)),                             # b2
                resident((hp, op)),                            # w3
                resident((1, op)),                             # b3
            ],
            out_specs=pl.BlockSpec((tm, op), lambda i: (i, 0)),
        ),
        compiler_params=pltpu.CompilerParams(
            dimension_semantics=("parallel",),
        ),
        cost_estimate=pl.CostEstimate(
            flops=flops, transcendentals=0, bytes_accessed=bytes_accessed),
    )(x, w1_p, b1_p, w2_p, b2_p, w3_p, b3_p)

    # Real Q-value columns; the slice stays inside the jit so it fuses with
    # whatever consumes the result.
    return out_padded[:, :out_dim]


def init_params(key, input_dim, hidden_dim, output_dim):
    """Deterministic parameter init (uniform, PyTorch-Linear-style bounds)."""
    ks = jax.random.split(key, 6)

    def lin(kw, kb, fan_in, fan_out):
        bound = 1.0 / (fan_in ** 0.5)
        w = jax.random.uniform(kw, (fan_in, fan_out), jnp.float32, -bound, bound)
        b = jax.random.uniform(kb, (1, fan_out), jnp.float32, -bound, bound)
        return w, b

    w1, b1 = lin(ks[0], ks[1], input_dim, hidden_dim)
    w2, b2 = lin(ks[2], ks[3], hidden_dim, hidden_dim)
    w3, b3 = lin(ks[4], ks[5], hidden_dim, output_dim)
    return w1, b1, w2, b2, w3, b3


if __name__ == "__main__":
    # DQN head: state dim 16, hidden 32, 4 actions. batch=256 takes the
    # single-grid-step path (weights resident, one lane-dense bf16 store).
    batch, input_dim, hidden_dim, output_dim = 256, 16, 32, 4

    key = jax.random.PRNGKey(0)
    kx, kp = jax.random.split(key)
    x = jax.random.normal(kx, (batch, input_dim), jnp.float32)
    raw_params = init_params(kp, input_dim, hidden_dim, output_dim)

    # One-time padding/cast of parameters (kept out of the per-call path).
    params = prepare_params(*raw_params)

    out = qnn_forward(x, *params, hidden_dim=hidden_dim, out_dim=output_dim,
                      block_m=1024)
    out = jax.block_until_ready(out)

    # Pure-JAX f32 reference (kernel uses bf16 MXU inputs and bf16 output
    # store -> looser tolerance).
    w1, b1, w2, b2, w3, b3 = raw_params
    ref = jnp.maximum(x @ w1 + b1, 0.0)
    ref = jnp.maximum(ref @ w2 + b2, 0.0)
    ref = ref @ w3 + b3

    assert out.shape == (batch, output_dim)
    max_err = float(jnp.max(jnp.abs(out.astype(jnp.float32) - ref)))
    assert max_err < 5e-2, max_err

    print("KERNEL_OK")
</pallas_src>

<mosaic_0001>
module attributes {stable_mosaic.version = 11 : i64} {
  func.func @qnn_kernel(%arg0: i32, %arg1: memref<256x16xf32, #tpu.memory_space<vmem>>, %arg2: memref<16x128xbf16, #tpu.memory_space<vmem>>, %arg3: memref<1x128xf32, #tpu.memory_space<vmem>>, %arg4: memref<128x128xbf16, #tpu.memory_space<vmem>>, %arg5: memref<1x128xf32, #tpu.memory_space<vmem>>, %arg6: memref<128x128xbf16, #tpu.memory_space<vmem>>, %arg7: memref<1x128xf32, #tpu.memory_space<vmem>>, %arg8: memref<256x128xbf16, #tpu.memory_space<vmem>>) attributes {dimension_semantics = [#tpu.dimension_semantics<parallel>], iteration_bounds = array<i64: 1>, scalar_prefetch = 0 : i64, scratch_operands = 0 : i64, tpu.core_type = #tpu.core_type<tc>, window_params = [{transform_indices = @transform_0, window_bounds = array<i64: 256, 16>}, {pipeline_mode = #tpu.pipeline_mode<synchronous>, transform_indices = @transform_1, window_bounds = array<i64: 16, 128>}, {pipeline_mode = #tpu.pipeline_mode<synchronous>, transform_indices = @transform_2, window_bounds = array<i64: 1, 128>}, {pipeline_mode = #tpu.pipeline_mode<synchronous>, transform_indices = @transform_3, window_bounds = array<i64: 128, 128>}, {pipeline_mode = #tpu.pipeline_mode<synchronous>, transform_indices = @transform_4, window_bounds = array<i64: 1, 128>}, {pipeline_mode = #tpu.pipeline_mode<synchronous>, transform_indices = @transform_5, window_bounds = array<i64: 128, 128>}, {pipeline_mode = #tpu.pipeline_mode<synchronous>, transform_indices = @transform_6, window_bounds = array<i64: 1, 128>}, {transform_indices = @transform_7, window_bounds = array<i64: 256, 128>}]} {
    %c0 = arith.constant 0 : index
    %c0_0 = arith.constant 0 : index
    %0 = vector.load %arg1[%c0, %c0_0] : memref<256x16xf32, #tpu.memory_space<vmem>>, vector<256x16xf32>
    %1 = arith.truncf %0 : vector<256x16xf32> to vector<256x16xbf16>
    %c0_1 = arith.constant 0 : index
    %c0_2 = arith.constant 0 : index
    %2 = vector.load %arg2[%c0_1, %c0_2] : memref<16x128xbf16, #tpu.memory_space<vmem>>, vector<16x128xbf16>
    %cst = arith.constant dense<0.000000e+00> : vector<256x128xf32>
    %3 = tpu.matmul %1, %2, %cst {dimension_numbers = #tpu.dot_dimension_numbers<[1], [0], [0], [1], [0, 0, 1, 1], [], []>} : vector<256x16xbf16>, vector<16x128xbf16>, vector<256x128xf32> -> vector<256x128xf32>
    %c0_3 = arith.constant 0 : index
    %c0_4 = arith.constant 0 : index
    %4 = vector.load %arg3[%c0_3, %c0_4] : memref<1x128xf32, #tpu.memory_space<vmem>>, vector<1x128xf32>
    %5 = vector.broadcast %4 : vector<1x128xf32> to vector<256x128xf32>
    %6 = arith.addf %3, %5 : vector<256x128xf32>
    %cst_5 = arith.constant 0.000000e+00 : f32
    %7 = vector.broadcast %cst_5 : f32 to vector<256x128xf32>
    %8 = arith.maximumf %6, %7 : vector<256x128xf32>
    %9 = arith.truncf %8 : vector<256x128xf32> to vector<256x128xbf16>
    %c0_6 = arith.constant 0 : index
    %c0_7 = arith.constant 0 : index
    %10 = vector.load %arg4[%c0_6, %c0_7] : memref<128x128xbf16, #tpu.memory_space<vmem>>, vector<128x128xbf16>
    %cst_8 = arith.constant dense<0.000000e+00> : vector<256x128xf32>
    %11 = tpu.matmul %9, %10, %cst_8 {dimension_numbers = #tpu.dot_dimension_numbers<[1], [0], [0], [1], [0, 0, 1, 1], [], []>} : vector<256x128xbf16>, vector<128x128xbf16>, vector<256x128xf32> -> vector<256x128xf32>
    %c0_9 = arith.constant 0 : index
    %c0_10 = arith.constant 0 : index
    %12 = vector.load %arg5[%c0_9, %c0_10] : memref<1x128xf32, #tpu.memory_space<vmem>>, vector<1x128xf32>
    %13 = vector.broadcast %12 : vector<1x128xf32> to vector<256x128xf32>
    %14 = arith.addf %11, %13 : vector<256x128xf32>
    %cst_11 = arith.constant 0.000000e+00 : f32
    %15 = vector.broadcast %cst_11 : f32 to vector<256x128xf32>
    %16 = arith.maximumf %14, %15 : vector<256x128xf32>
    %17 = arith.truncf %16 : vector<256x128xf32> to vector<256x128xbf16>
    %c0_12 = arith.constant 0 : index
    %c0_13 = arith.constant 0 : index
    %18 = vector.load %arg6[%c0_12, %c0_13] : memref<128x128xbf16, #tpu.memory_space<vmem>>, vector<128x128xbf16>
    %cst_14 = arith.constant dense<0.000000e+00> : vector<256x128xf32>
    %19 = tpu.matmul %17, %18, %cst_14 {dimension_numbers = #tpu.dot_dimension_numbers<[1], [0], [0], [1], [0, 0, 1, 1], [], []>} : vector<256x128xbf16>, vector<128x128xbf16>, vector<256x128xf32> -> vector<256x128xf32>
    %c0_15 = arith.constant 0 : index
    %c0_16 = arith.constant 0 : index
    %20 = vector.load %arg7[%c0_15, %c0_16] : memref<1x128xf32, #tpu.memory_space<vmem>>, vector<1x128xf32>
    %21 = vector.broadcast %20 : vector<1x128xf32> to vector<256x128xf32>
    %22 = arith.addf %19, %21 : vector<256x128xf32>
    %23 = arith.truncf %22 : vector<256x128xf32> to vector<256x128xbf16>
    %c0_17 = arith.constant 0 : index
    %c0_18 = arith.constant 0 : index
    %24 = vector.load %arg8[%c0_17, %c0_18] : memref<256x128xbf16, #tpu.memory_space<vmem>>, vector<256x128xbf16>
    tpu.vector_store %arg8[%c0_17, %c0_18], %23 {strides = array<i32>} : memref<256x128xbf16, #tpu.memory_space<vmem>>, vector<256x128xbf16>,
    return
  }
  func.func @transform_0(%arg0: i32) -> (i32, i32) {
    %c0_i32 = arith.constant 0 : i32
    %c0_i32_0 = arith.constant 0 : i32
    return %arg0, %c0_i32 : i32, i32
  }
  func.func @transform_1(%arg0: i32) -> (i32, i32) {
    %c0_i32 = arith.constant 0 : i32
    %c0_i32_0 = arith.constant 0 : i32
    %c0_i32_1 = arith.constant 0 : i32
    return %c0_i32, %c0_i32_0 : i32, i32
  }
  func.func @transform_2(%arg0: i32) -> (i32, i32) {
    %c0_i32 = arith.constant 0 : i32
    %c0_i32_0 = arith.constant 0 : i32
    %c0_i32_1 = arith.constant 0 : i32
    return %c0_i32, %c0_i32_0 : i32, i32
  }
  func.func @transform_3(%arg0: i32) -> (i32, i32) {
    %c0_i32 = arith.constant 0 : i32
    %c0_i32_0 = arith.constant 0 : i32
    %c0_i32_1 = arith.constant 0 : i32
    return %c0_i32, %c0_i32_0 : i32, i32
  }
  func.func @transform_4(%arg0: i32) -> (i32, i32) {
    %c0_i32 = arith.constant 0 : i32
    %c0_i32_0 = arith.constant 0 : i32
    %c0_i32_1 = arith.constant 0 : i32
    return %c0_i32, %c0_i32_0 : i32, i32
  }
  func.func @transform_5(%arg0: i32) -> (i32, i32) {
    %c0_i32 = arith.constant 0 : i32
    %c0_i32_0 = arith.constant 0 : i32
    %c0_i32_1 = arith.constant 0 : i32
    return %c0_i32, %c0_i32_0 : i32, i32
  }
  func.func @transform_6(%arg0: i32) -> (i32, i32) {
    %c0_i32 = arith.constant 0 : i32
    %c0_i32_0 = arith.constant 0 : i32
    %c0_i32_1 = arith.constant 0 : i32
    return %c0_i32, %c0_i32_0 : i32, i32
  }
  func.func @transform_7(%arg0: i32) -> (i32, i32) {
    %c0_i32 = arith.constant 0 : i32
    %c0_i32_0 = arith.constant 0 : i32
    return %arg0, %c0_i32 : i32, i32
  }
}

</mosaic_0001>

<bundles_post_ra>
// kernel: qnn_forward.1
= control target key start
LH: loop header
LB: loop body
LE: loop exit
PB: predicated region body
PF: predicated region fallthrough
CT: control target
= control target key end

     0   :  { %vm90_vm0 = vcmask 130048   ;;  %s1801_s1 = inlined_call_operand.vmem [shape: bf16[16,128], index: 1, kind: input, shape index: {}]   ;;  %s1802_s0 = inlined_call_operand.vmem [shape: f32[256,16], index: 0, kind: input, shape index: {}]   ;;  %s1803_s3 = inlined_call_operand.vmem [shape: bf16[128,128], index: 3, kind: input, shape index: {}]   ;;  %s1804_s5 = inlined_call_operand.vmem [shape: bf16[128,128], index: 5, kind: input, shape index: {}]   ;;  %s1805_s2 = inlined_call_operand.vmem [shape: f32[1,128], index: 2, kind: input, shape index: {}]   ;;  %s1806_s4 = inlined_call_operand.vmem [shape: f32[1,128], index: 4, kind: input, shape index: {}]   ;;  %s1807_s6 = inlined_call_operand.vmem [shape: f32[1,128], index: 6, kind: input, shape index: {}]   ;;  %s1808_s7 = inlined_call_operand.vmem [shape: bf16[256,128], index: 7, kind: output, shape index: {}]  }
   0x1   :  { %v1416_v0 = vld [vmem:[%s1801_s1] sm:$0xff]   ;;  %v28_v2 = vld [vmem:[%s1802_s0 + $0x8] sm:$0xff]  ;;  %v29_v3 = vld [vmem:[%s1802_s0 + $0x10] sm:$0xff] }
   0x2   :  { %v27_v1 = vld [vmem:[%s1802_s0] sm:$0xff]  ;;  %1284 = vmatprep.subr.bf16.mxu0 %v1416_v0  ;;  %v30_v5 = vld [vmem:[%s1802_s0 + $0x18] sm:$0xff]  ;;  %v32_v7 = vld [vmem:[%s1802_s0 + $0x28] sm:$0xff]  ;;  %1414 = vmatprep.subr.bf16.mxu1 %v1416_v0 }
   0x3   :  { %v59_v4 = vpack.c.bf16 %v28_v2, %v27_v1  ;;  %v31_v6 = vld [vmem:[%s1802_s0 + $0x20] sm:$0xff]  ;;  %1285 = vmatpush3.bf16.msra.mxu0 %v1416_v0  ;;  %v60_v8 = vpack.c.bf16 %v30_v5, %v29_v3  ;;  %1415 = vmatpush3.bf16.msra.mxu1 %v1416_v0  ;;  %v33_v10 = vld [vmem:[%s1802_s0 + $0x30] sm:$0xff]  ;;  %v34_v11 = vld [vmem:[%s1802_s0 + $0x38] sm:$0xff] }
   0x4   :  { %v61_v9 = vpack.c.bf16 %v32_v7, %v31_v6  ;;  %v43_v12 = vld [vmem:[%s1802_s0 + $0x80] sm:$0xff]  ;;  %v44_v13 = vld [vmem:[%s1802_s0 + $0x88] sm:$0xff]  ;;  %v45_v15 = vld [vmem:[%s1802_s0 + $0x90] sm:$0xff]  ;;  %v62_v23 = vpack.c.bf16 %v34_v11, %v33_v10 }
   0x5   :  { %1286 = vmatprep.mubr.msk.bf16.mxu0 %vm90_vm0, %v59_v4  ;;  %v67_v14 = vpack.c.bf16 %v44_v13, %v43_v12  ;;  %v46_v16 = vld [vmem:[%s1802_s0 + $0x98] sm:$0xff]  ;;  %v47_v17 = vld [vmem:[%s1802_s0 + $0xa0] sm:$0xff]  ;;  %v36_v19 = vld [vmem:[%s1802_s0 + $0x48] sm:$0xff] }
   0x6   :  { %1287 = vmatmul.mubr.msk.bf16.vlgmr.msra.gmra.mrb[0].mxu0 %vm90_vm0, %v60_v8  ;;  %v35_v18 = vld [vmem:[%s1802_s0 + $0x40] sm:$0xff]  ;;  %v68_v20 = vpack.c.bf16 %v46_v16, %v45_v15  ;;  %v48_v21 = vld [vmem:[%s1802_s0 + $0xa8] sm:$0xff]  ;;  %v49_v24 = vld [vmem:[%s1802_s0 + $0xb0] sm:$0xff] }
   0x7   :  { %1290 = vmatprep.mubr.msk.bf16.mxu0 %vm90_vm0, %v61_v9  ;;  %1302 = vmatprep.mubr.msk.bf16.mxu1 %vm90_vm0, %v67_v14  ;;  %v69_v22 = vpack.c.bf16 %v48_v21, %v47_v17  ;;  %v50_v25 = vld [vmem:[%s1802_s0 + $0xb8] sm:$0xff]  ;;  %v63_v26 = vpack.c.bf16 %v36_v19, %v35_v18  ;;  %v51_v27 = vld [vmem:[%s1802_s0 + $0xc0] sm:$0xff]  ;;  %v52_v28 = vld [vmem:[%s1802_s0 + $0xc8] sm:$0xff] }
   0x8   :  { %1303 = vmatmul.mubr.msk.bf16.vlgmr.msra.gmra.mrb[0].mxu1 %vm90_vm0, %v68_v20  ;;  %v1417_v29 = vld [vmem:[%s1803_s3] sm:$0xff]   ;;  %v37_v30 = vld [vmem:[%s1802_s0 + $0x50] sm:$0xff]  ;;  %v38_v31 = vld [vmem:[%s1802_s0 + $0x58] sm:$0xff]  ;;  %v70_v34 = vpack.c.bf16 %v50_v25, %v49_v24  ;;  %v71_v36 = vpack.c.bf16 %v52_v28, %v51_v27 }
   0x9   :  { %1306 = vmatprep.mubr.msk.bf16.mxu1 %vm90_vm0, %v69_v22  ;;  %v1418_v32 = vld [vmem:[%s1803_s3 + $0x8] sm:$0xff]   ;;  %v39_v33 = vld [vmem:[%s1802_s0 + $0x60] sm:$0xff]  ;;  %1318 = vmatprep.subr.bf16.mxu1 %v1417_v29  ;;  %v1419_v37 = vld [vmem:[%s1803_s3 + $0x10] sm:$0xff]   ;;  %v64_v38 = vpack.c.bf16 %v38_v31, %v37_v30 }
   0xa   :  { %v40_v35 = vld [vmem:[%s1802_s0 + $0x68] sm:$0xff]  ;;  %1319 = vmatpush3.bf16.msra.mxu1 %v1417_v29  ;;  %v53_v40 = vld [vmem:[%s1802_s0 + $0xd0] sm:$0xff]  ;;  %v54_v41 = vld [vmem:[%s1802_s0 + $0xd8] sm:$0xff] }
   0xb   :  { %1320 = vmatprep.subr.bf16.mxu1 %v1418_v32  ;;  %v65_v39 = vpack.c.bf16 %v40_v35, %v39_v33  ;;  %v55_v42 = vld [vmem:[%s1802_s0 + $0xe0] sm:$0xff]  ;;  %v56_v43 = vld [vmem:[%s1802_s0 + $0xe8] sm:$0xff]  ;;  %v1420_v44 = vld [vmem:[%s1803_s3 + $0x18] sm:$0xff]   ;;  %v72_v45 = vpack.c.bf16 %v54_v41, %v53_v40 }
   0xc   :  { %v41_v46 = vld [vmem:[%s1802_s0 + $0x70] sm:$0xff]  ;;  %v42_v47 = vld [vmem:[%s1802_s0 + $0x78] sm:$0xff]  ;;  %v73_v48 = vpack.c.bf16 %v56_v43, %v55_v42  ;;  %v1421_v49 = vld [vmem:[%s1803_s3 + $0x20] sm:$0xff]  }
   0xd   :  { %v66_v50 = vpack.c.bf16 %v42_v47, %v41_v46  ;;  %v57_v51 = vld [vmem:[%s1802_s0 + $0xf0] sm:$0xff]  ;;  %v58_v52 = vld [vmem:[%s1802_s0 + $0xf8] sm:$0xff]  ;;  %v1422_v53 = vld [vmem:[%s1803_s3 + $0x28] sm:$0xff]  }
   0xe   :  { %1291 = vmatmul.mubr.msk.bf16.gmra.mrb[4].mxu0 %vm90_vm0, %v62_v23  ;;  %1321 = vmatpush3.bf16.msra.mxu1 %v1418_v32  ;;  %v74_v54 = vpack.c.bf16 %v58_v52, %v57_v51  ;;  %v1423_v55 = vld [vmem:[%s1803_s3 + $0x30] sm:$0xff]   ;;  %v1424_v56 = vld [vmem:[%s1803_s3 + $0x38] sm:$0xff]   ;;  %v1425_v57 = vld [vmem:[%s1804_s5] sm:$0xff]  }
   0xf   :  { %1294 = vmatprep.mubr.msk.bf16.mxu0 %vm90_vm0, %v63_v26  ;;  %1322 = vmatprep.subr.bf16.mxu1 %v1419_v37  ;;  %v1426_v58 = vld [vmem:[%s1804_s5 + $0x8] sm:$0xff]   ;;  %v1427_v59 = vld [vmem:[%s1804_s5 + $0x10] sm:$0xff]   ;;  %v1428_v60 = vld [vmem:[%s1804_s5 + $0x18] sm:$0xff]  }
  0x10   :  { %1307 = vmatmul.mubr.msk.bf16.gmra.mrb[4].mxu1 %vm90_vm0, %v70_v34  ;;  %1366 = vmatprep.subr.bf16.mxu0 %v1425_v57  ;;  %v1429_v61 = vld [vmem:[%s1804_s5 + $0x20] sm:$0xff]   ;;  %v1430_v62 = vld [vmem:[%s1804_s5 + $0x28] sm:$0xff]  }
  0x11   :  { %1310 = vmatprep.mubr.msk.bf16.mxu1 %vm90_vm0, %v71_v36  ;;  %1367 = vmatpush3.bf16.msra.mxu0 %v1425_v57  ;;  %v1633_v63 = vld [vmem:[%s1805_s2] ss:$0 sm:$0xff] }
  0x12   :  { %1323 = vmatpush3.bf16.msra.mxu1 %v1419_v37  ;;  %1368 = vmatprep.subr.bf16.mxu0 %v1426_v58 }
  0x13   :  { %1324 = vmatprep.subr.bf16.mxu1 %v1420_v44 }
  0x15   :  { %1369 = vmatpush3.bf16.msra.mxu0 %v1426_v58 }
  0x16   :  { %1295 = vmatmul.mubr.msk.bf16.gmra.mrb[8].mxu0 %vm90_vm0, %v64_v38  ;;  %1325 = vmatpush3.bf16.msra.mxu1 %v1420_v44 }
  0x17   :  { %1298 = vmatprep.mubr.msk.bf16.mxu0 %vm90_vm0, %v65_v39  ;;  %1326 = vmatprep.subr.bf16.mxu1 %v1421_v49 }
  0x18   :  { %1311 = vmatmul.mubr.msk.bf16.gmra.mrb[8].mxu1 %vm90_vm0, %v72_v45  ;;  %1370 = vmatprep.subr.bf16.mxu0 %v1427_v59 }
  0x19   :  { %1314 = vmatprep.mubr.msk.bf16.mxu1 %vm90_vm0, %v73_v48  ;;  %1371 = vmatpush3.bf16.msra.mxu0 %v1427_v59 }
  0x1a   :  { %1327 = vmatpush3.bf16.msra.mxu1 %v1421_v49  ;;  %1372 = vmatprep.subr.bf16.mxu0 %v1428_v60 }
  0x1b   :  { %1328 = vmatprep.subr.bf16.mxu1 %v1422_v53 }
  0x1d   :  { %1373 = vmatpush3.bf16.msra.mxu0 %v1428_v60 }
  0x1e   :  { %1299 = vmatmul.mubr.msk.bf16.gmra.mrb[12].mxu0 %vm90_vm0, %v66_v50  ;;  %1329 = vmatpush3.bf16.msra.mxu1 %v1422_v53 }
  0x1f   :  { %1330 = vmatprep.subr.bf16.mxu1 %v1423_v55  ;;  %1374 = vmatprep.subr.bf16.mxu0 %v1429_v61 }
  0x20   :  { %1315 = vmatmul.mubr.msk.bf16.gmra.mrb[12].mxu1 %vm90_vm0, %v74_v54 }
  0x21   :  { %1375 = vmatpush3.bf16.msra.mxu0 %v1429_v61 }
  0x22   :  { %1331 = vmatpush3.bf16.msra.mxu1 %v1423_v55  ;;  %1376 = vmatprep.subr.bf16.mxu0 %v1430_v62 }
  0x23   :  { %1332 = vmatprep.subr.bf16.mxu1 %v1424_v56 }
  0x25   :  { %1377 = vmatpush3.bf16.msra.mxu0 %v1430_v62 }
  0x26   :  { %1333 = vmatpush3.bf16.msra.mxu1 %v1424_v56 }
  0xd9   :  { %v1288_v0 = vpop.f32.mrb[0].mxu0 }
  0xda   :  { %v182_v1 = vadd.f32 %v1288_v0, %v1633_v63  ;;  %v173_v2 = vpop.f32.mrb[1].mxu0 }
  0xdb   :  { %v174_v3 = vadd.f32 %v1633_v63, %v173_v2  ;;  %v1289_v4 = vpop.f32.mrb[2].mxu0  ;;  %v1304_v8 = vpop.f32.mrb[0].mxu1 }
  0xdc   :  { %v185_v5 = vadd.f32 %v1289_v4, %v1633_v63  ;;  %v176_v6 = vpop.f32.mrb[3].mxu0  ;;  %v302_v9 = vmax.f32 %v182_v1, 0.0  ;;  %v246_v11 = vadd.f32 %v1304_v8, %v1633_v63  ;;  %v237_v12 = vpop.f32.mrb[1].mxu1 }
  0xdd   :  { %v177_v7 = vadd.f32 %v1633_v63, %v176_v6  ;;  %v300_v13 = vmax.f32 %v174_v3, 0.0  ;;  %v238_v15 = vadd.f32 %v1633_v63, %v237_v12  ;;  %v1305_v16 = vpop.f32.mrb[2].mxu1 }
  0xde   :  { %v303_v10 = vmax.f32 %v185_v5, 0.0  ;;  %v318_v18 = vmax.f32 %v246_v11, 0.0  ;;  %v249_v19 = vadd.f32 %v1305_v16, %v1633_v63  ;;  %v240_v20 = vpop.f32.mrb[3].mxu1 }
  0xdf   :  { %v301_v14 = vmax.f32 %v177_v7, 0.0  ;;  %v316_v23 = vmax.f32 %v238_v15, 0.0  ;;  %v241_v24 = vadd.f32 %v1633_v63, %v240_v20 }
  0xe0   :  { %v333_v17 = vpack.c.bf16 %v303_v10, %v302_v9  ;;  %v319_v27 = vmax.f32 %v249_v19, 0.0 }
  0xe1   :  { %v332_v21 = vpack.c.bf16 %v301_v14, %v300_v13  ;;  %v1292_v22 = vpop.f32.mrb[4].mxu0  ;;  %v317_v30 = vmax.f32 %v241_v24, 0.0 }
  0xe2   :  { %v198_v25 = vadd.f32 %v1292_v22, %v1633_v63  ;;  %v189_v26 = vpop.f32.mrb[5].mxu0  ;;  %v1646_v33 = vpack.c.bf16 %v319_v27, %v318_v18 }
  0xe3   :  { %v190_v28 = vadd.f32 %v1633_v63, %v189_v26  ;;  %v1293_v29 = vpop.f32.mrb[6].mxu0  ;;  %1334 = vmatprep.mubr.bf16.mxu1 %v332_v21  ;;  %v1649_v35 = vpack.c.bf16 %v317_v30, %v316_v23  ;;  %v1308_v36 = vpop.f32.mrb[4].mxu1 }
  0xe4   :  { %v201_v31 = vadd.f32 %v1293_v29, %v1633_v63  ;;  %v192_v32 = vpop.f32.mrb[7].mxu0  ;;  %1335 = vmatmul.mubr.bf16.vlgmr.msra.gmra.mrb[16].mxu1 %v333_v17  ;;  %v306_v37 = vmax.f32 %v198_v25, 0.0  ;;  %v262_v39 = vadd.f32 %v1308_v36, %v1633_v63  ;;  %v253_v40 = vpop.f32.mrb[5].mxu1 }
  0xe5   :  { %v193_v34 = vadd.f32 %v1633_v63, %v192_v32  ;;  %v304_v41 = vmax.f32 %v190_v28, 0.0  ;;  %v254_v43 = vadd.f32 %v1633_v63, %v253_v40  ;;  %v1309_v44 = vpop.f32.mrb[6].mxu1 }
  0xe6   :  { %v307_v38 = vmax.f32 %v201_v31, 0.0  ;;  %v322_v46 = vmax.f32 %v262_v39, 0.0  ;;  %v265_v47 = vadd.f32 %v1309_v44, %v1633_v63  ;;  %v256_v48 = vpop.f32.mrb[7].mxu1 }
  0xe7   :  { %v305_v42 = vmax.f32 %v193_v34, 0.0  ;;  %v320_v51 = vmax.f32 %v254_v43, 0.0  ;;  %v257_v52 = vadd.f32 %v1633_v63, %v256_v48 }
  0xe8   :  { %v335_v45 = vpack.c.bf16 %v307_v38, %v306_v37  ;;  %v323_v55 = vmax.f32 %v265_v47, 0.0 }
  0xe9   :  { %v334_v49 = vpack.c.bf16 %v305_v42, %v304_v41  ;;  %v1296_v50 = vpop.f32.mrb[8].mxu0  ;;  %v321_v58 = vmax.f32 %v257_v52, 0.0 }
  0xea   :  { %v214_v53 = vadd.f32 %v1296_v50, %v1633_v63  ;;  %v205_v54 = vpop.f32.mrb[9].mxu0  ;;  %v343_v61 = vpack.c.bf16 %v323_v55, %v322_v46 }
  0xeb   :  { %v206_v56 = vadd.f32 %v1633_v63, %v205_v54  ;;  %v1297_v57 = vpop.f32.mrb[10].mxu0  ;;  %1338 = vmatprep.mubr.bf16.mxu1 %v334_v49  ;;  %v342_v0 = vpack.c.bf16 %v321_v58, %v320_v51  ;;  %v1312_v1 = vpop.f32.mrb[8].mxu1  ;;  %v1432_v51 = vld [vmem:[%s1804_s5 + $0x38] sm:$0xff]  }
  0xec   :  { %v217_v59 = vadd.f32 %v1297_v57, %v1633_v63  ;;  %v208_v60 = vpop.f32.mrb[11].mxu0  ;;  %1339 = vmatmul.mubr.bf16.gmra.mrb[20].mxu1 %v335_v45  ;;  %v310_v2 = vmax.f32 %v214_v53, 0.0  ;;  %v278_v4 = vadd.f32 %v1312_v1, %v1633_v63  ;;  %v269_v5 = vpop.f32.mrb[9].mxu1 }
  0xed   :  { %v209_v62 = vadd.f32 %v1633_v63, %v208_v60  ;;  %v308_v6 = vmax.f32 %v206_v56, 0.0  ;;  %v270_v8 = vadd.f32 %v1633_v63, %v269_v5  ;;  %v1313_v9 = vpop.f32.mrb[10].mxu1 }
  0xee   :  { %v311_v3 = vmax.f32 %v217_v59, 0.0  ;;  %v326_v11 = vmax.f32 %v278_v4, 0.0  ;;  %v281_v12 = vadd.f32 %v1313_v9, %v1633_v63  ;;  %v272_v13 = vpop.f32.mrb[11].mxu1 }
  0xef   :  { %v309_v7 = vmax.f32 %v209_v62, 0.0  ;;  %v324_v16 = vmax.f32 %v270_v8, 0.0  ;;  %v273_v17 = vadd.f32 %v1633_v63, %v272_v13 }
  0xf0   :  { %v337_v10 = vpack.c.bf16 %v311_v3, %v310_v2  ;;  %v327_v20 = vmax.f32 %v281_v12, 0.0 }
  0xf1   :  { %v336_v14 = vpack.c.bf16 %v309_v7, %v308_v6  ;;  %v1300_v15 = vpop.f32.mrb[12].mxu0  ;;  %v325_v23 = vmax.f32 %v273_v17, 0.0 }
  0xf2   :  { %v230_v18 = vadd.f32 %v1300_v15, %v1633_v63  ;;  %v221_v19 = vpop.f32.mrb[13].mxu0  ;;  %v345_v26 = vpack.c.bf16 %v327_v20, %v326_v11 }
  0xf3   :  { %v222_v21 = vadd.f32 %v1633_v63, %v221_v19  ;;  %v1301_v22 = vpop.f32.mrb[14].mxu0  ;;  %1342 = vmatprep.mubr.bf16.mxu1 %v336_v14  ;;  %v344_v28 = vpack.c.bf16 %v325_v23, %v324_v16  ;;  %v1316_v29 = vpop.f32.mrb[12].mxu1 }
  0xf4   :  { %v233_v24 = vadd.f32 %v1301_v22, %v1633_v63  ;;  %v224_v25 = vpop.f32.mrb[15].mxu0  ;;  %1343 = vmatmul.mubr.bf16.gmra.mrb[24].mxu1 %v337_v10  ;;  %v314_v30 = vmax.f32 %v230_v18, 0.0  ;;  %v294_v32 = vadd.f32 %v1316_v29, %v1633_v63  ;;  %v285_v34 = vpop.f32.mrb[13].mxu1 }
  0xf5   :  { %v225_v27 = vadd.f32 %v1633_v63, %v224_v25  ;;  %v312_v36 = vmax.f32 %v222_v21, 0.0  ;;  %v286_v38 = vadd.f32 %v1633_v63, %v285_v34  ;;  %v1317_v39 = vpop.f32.mrb[14].mxu1 }
  0xf6   :  { %v315_v31 = vmax.f32 %v233_v24, 0.0  ;;  %v330_v41 = vmax.f32 %v294_v32, 0.0  ;;  %v297_v42 = vadd.f32 %v1317_v39, %v1633_v63  ;;  %v288_v43 = vpop.f32.mrb[15].mxu1 }
  0xf7   :  { %v313_v37 = vmax.f32 %v225_v27, 0.0  ;;  %v328_v45 = vmax.f32 %v286_v38, 0.0  ;;  %v289_v46 = vadd.f32 %v1633_v63, %v288_v43  ;;  %v1431_v63 = vld [vmem:[%s1804_s5 + $0x30] sm:$0xff]  }
  0xf8   :  { %v339_v40 = vpack.c.bf16 %v315_v31, %v314_v30  ;;  %v331_v47 = vmax.f32 %v297_v42, 0.0  ;;  %1378 = vmatprep.subr.bf16.mxu0 %v1431_v63 }
  0xf9   :  { %v338_v44 = vpack.c.bf16 %v313_v37, %v312_v36  ;;  %v329_v48 = vmax.f32 %v289_v46, 0.0  ;;  %1379 = vmatpush3.bf16.msra.mxu0 %v1431_v63 }
  0xfa   :  { %v347_v49 = vpack.c.bf16 %v331_v47, %v330_v41  ;;  %1380 = vmatprep.subr.bf16.mxu0 %v1432_v51 }
  0xfb   :  { %1346 = vmatprep.mubr.bf16.mxu1 %v338_v44  ;;  %v346_v50 = vpack.c.bf16 %v329_v48, %v328_v45 }
  0xfc   :  { %1347 = vmatmul.mubr.bf16.gmra.mrb[28].mxu1 %v339_v40 }
  0xfd   :  { %1350 = vmatprep.mubr.bf16.mxu1 %v1649_v35  ;;  %1381 = vmatpush3.bf16.msra.mxu0 %v1432_v51 }
 0x104   :  { %1351 = vmatmul.mubr.bf16.gmra.mrb[32].mxu1 %v1646_v33  ;;  %v1682_v33 = vld [vmem:[%s1806_s4] ss:$0 sm:$0xff] }
 0x105   :  { %1354 = vmatprep.mubr.bf16.mxu1 %v342_v0 }
 0x10c   :  { %1355 = vmatmul.mubr.bf16.gmra.mrb[36].mxu1 %v343_v61 }
 0x10d   :  { %1358 = vmatprep.mubr.bf16.mxu1 %v344_v28 }
 0x114   :  { %1359 = vmatmul.mubr.bf16.gmra.mrb[40].mxu1 %v345_v26 }
 0x115   :  { %1362 = vmatprep.mubr.bf16.mxu1 %v346_v50 }
 0x11c   :  { %1363 = vmatmul.mubr.bf16.gmra.mrb[44].mxu1 %v347_v49 }
 0x1b7   :  { %v1336_v35 = vpop.f32.mrb[16].mxu1 }
 0x1b8   :  { %v462_v52 = vadd.f32 %v1336_v35, %v1682_v33  ;;  %v453_v53 = vpop.f32.mrb[17].mxu1 }
 0x1b9   :  { %v454_v54 = vadd.f32 %v1682_v33, %v453_v53  ;;  %v1337_v55 = vpop.f32.mrb[18].mxu1 }
 0x1ba   :  { %v465_v56 = vadd.f32 %v1337_v55, %v1682_v33  ;;  %v456_v57 = vpop.f32.mrb[19].mxu1  ;;  %v582_v59 = vmax.f32 %v462_v52, 0.0 }
 0x1bb   :  { %v457_v58 = vadd.f32 %v1682_v33, %v456_v57  ;;  %v580_v61 = vmax.f32 %v454_v54, 0.0 }
 0x1bc   :  { %v583_v60 = vmax.f32 %v465_v56, 0.0 }
 0x1bd   :  { %v581_v62 = vmax.f32 %v457_v58, 0.0 }
 0x1be   :  { %v613_v0 = vpack.c.bf16 %v583_v60, %v582_v59 }
 0x1bf   :  { %v612_v1 = vpack.c.bf16 %v581_v62, %v580_v61  ;;  %v1340_v2 = vpop.f32.mrb[20].mxu1 }
 0x1c0   :  { %v478_v3 = vadd.f32 %v1340_v2, %v1682_v33  ;;  %v469_v4 = vpop.f32.mrb[21].mxu1 }
 0x1c1   :  { %v470_v5 = vadd.f32 %v1682_v33, %v469_v4  ;;  %v1341_v6 = vpop.f32.mrb[22].mxu1  ;;  %1382 = vmatprep.mubr.bf16.mxu0 %v612_v1 }
 0x1c2   :  { %v481_v7 = vadd.f32 %v1341_v6, %v1682_v33  ;;  %v472_v8 = vpop.f32.mrb[23].mxu1  ;;  %1383 = vmatmul.mubr.bf16.vlgmr.msra.gmra.mrb[16].mxu0 %v613_v0  ;;  %v586_v10 = vmax.f32 %v478_v3, 0.0 }
 0x1c3   :  { %v473_v9 = vadd.f32 %v1682_v33, %v472_v8  ;;  %v584_v12 = vmax.f32 %v470_v5, 0.0 }
 0x1c4   :  { %v587_v11 = vmax.f32 %v481_v7, 0.0 }
 0x1c5   :  { %v585_v13 = vmax.f32 %v473_v9, 0.0 }
 0x1c6   :  { %v615_v14 = vpack.c.bf16 %v587_v11, %v586_v10 }
 0x1c7   :  { %v614_v15 = vpack.c.bf16 %v585_v13, %v584_v12  ;;  %v1344_v16 = vpop.f32.mrb[24].mxu1 }
 0x1c8   :  { %v494_v17 = vadd.f32 %v1344_v16, %v1682_v33  ;;  %v485_v18 = vpop.f32.mrb[25].mxu1 }
 0x1c9   :  { %v486_v19 = vadd.f32 %v1682_v33, %v485_v18  ;;  %v1345_v20 = vpop.f32.mrb[26].mxu1  ;;  %1386 = vmatprep.mubr.bf16.mxu0 %v614_v15 }
 0x1ca   :  { %v497_v21 = vadd.f32 %v1345_v20, %v1682_v33  ;;  %v488_v22 = vpop.f32.mrb[27].mxu1  ;;  %1387 = vmatmul.mubr.bf16.gmra.mrb[20].mxu0 %v615_v14  ;;  %v590_v24 = vmax.f32 %v494_v17, 0.0 }
 0x1cb   :  { %v489_v23 = vadd.f32 %v1682_v33, %v488_v22  ;;  %v588_v26 = vmax.f32 %v486_v19, 0.0 }
 0x1cc   :  { %v591_v25 = vmax.f32 %v497_v21, 0.0 }
 0x1cd   :  { %v589_v27 = vmax.f32 %v489_v23, 0.0 }
 0x1ce   :  { %v617_v28 = vpack.c.bf16 %v591_v25, %v590_v24 }
 0x1cf   :  { %v616_v29 = vpack.c.bf16 %v589_v27, %v588_v26  ;;  %v1348_v30 = vpop.f32.mrb[28].mxu1 }
 0x1d0   :  { %v510_v31 = vadd.f32 %v1348_v30, %v1682_v33  ;;  %v501_v32 = vpop.f32.mrb[29].mxu1 }
 0x1d1   :  { %v502_v34 = vadd.f32 %v1682_v33, %v501_v32  ;;  %v1349_v36 = vpop.f32.mrb[30].mxu1  ;;  %1390 = vmatprep.mubr.bf16.mxu0 %v616_v29 }
 0x1d2   :  { %v513_v37 = vadd.f32 %v1349_v36, %v1682_v33  ;;  %v504_v38 = vpop.f32.mrb[31].mxu1  ;;  %1391 = vmatmul.mubr.bf16.gmra.mrb[24].mxu0 %v617_v28  ;;  %v594_v40 = vmax.f32 %v510_v31, 0.0 }
 0x1d3   :  { %v505_v39 = vadd.f32 %v1682_v33, %v504_v38  ;;  %v592_v42 = vmax.f32 %v502_v34, 0.0 }
 0x1d4   :  { %v595_v41 = vmax.f32 %v513_v37, 0.0 }
 0x1d5   :  { %v593_v43 = vmax.f32 %v505_v39, 0.0 }
 0x1d6   :  { %v619_v44 = vpack.c.bf16 %v595_v41, %v594_v40  ;;  %v1719_v40 = vld [vmem:[%s1807_s6] ss:$0 sm:$0xff] }
 0x1d7   :  { %v618_v45 = vpack.c.bf16 %v593_v43, %v592_v42  ;;  %v1352_v46 = vpop.f32.mrb[32].mxu1 }
 0x1d8   :  { %v526_v47 = vadd.f32 %v1352_v46, %v1682_v33  ;;  %v517_v48 = vpop.f32.mrb[33].mxu1 }
 0x1d9   :  { %v518_v49 = vadd.f32 %v1682_v33, %v517_v48  ;;  %v1353_v50 = vpop.f32.mrb[34].mxu1  ;;  %1394 = vmatprep.mubr.bf16.mxu0 %v618_v45 }
 0x1da   :  { %v529_v63 = vadd.f32 %v1353_v50, %v1682_v33  ;;  %v520_v51 = vpop.f32.mrb[35].mxu1  ;;  %1395 = vmatmul.mubr.bf16.gmra.mrb[28].mxu0 %v619_v44  ;;  %v598_v52 = vmax.f32 %v526_v47, 0.0 }
 0x1db   :  { %v521_v35 = vadd.f32 %v1682_v33, %v520_v51  ;;  %v596_v54 = vmax.f32 %v518_v49, 0.0 }
 0x1dc   :  { %v599_v53 = vmax.f32 %v529_v63, 0.0 }
 0x1dd   :  { %v597_v55 = vmax.f32 %v521_v35, 0.0 }
 0x1de   :  { %v621_v56 = vpack.c.bf16 %v599_v53, %v598_v52 }
 0x1df   :  { %v620_v57 = vpack.c.bf16 %v597_v55, %v596_v54  ;;  %v1356_v58 = vpop.f32.mrb[36].mxu1 }
 0x1e0   :  { %v542_v59 = vadd.f32 %v1356_v58, %v1682_v33  ;;  %v533_v60 = vpop.f32.mrb[37].mxu1 }
 0x1e1   :  { %v534_v61 = vadd.f32 %v1682_v33, %v533_v60  ;;  %v1357_v62 = vpop.f32.mrb[38].mxu1  ;;  %1398 = vmatprep.mubr.bf16.mxu0 %v620_v57 }
 0x1e2   :  { %v545_v0 = vadd.f32 %v1357_v62, %v1682_v33  ;;  %v536_v1 = vpop.f32.mrb[39].mxu1  ;;  %1399 = vmatmul.mubr.bf16.gmra.mrb[32].mxu0 %v621_v56  ;;  %v602_v3 = vmax.f32 %v542_v59, 0.0 }
 0x1e3   :  { %v537_v2 = vadd.f32 %v1682_v33, %v536_v1  ;;  %v600_v5 = vmax.f32 %v534_v61, 0.0 }
 0x1e4   :  { %v603_v4 = vmax.f32 %v545_v0, 0.0 }
 0x1e5   :  { %v601_v6 = vmax.f32 %v537_v2, 0.0 }
 0x1e6   :  { %v623_v7 = vpack.c.bf16 %v603_v4, %v602_v3 }
 0x1e7   :  { %v622_v8 = vpack.c.bf16 %v601_v6, %v600_v5  ;;  %v1360_v9 = vpop.f32.mrb[40].mxu1 }
 0x1e8   :  { %v558_v10 = vadd.f32 %v1360_v9, %v1682_v33  ;;  %v549_v11 = vpop.f32.mrb[41].mxu1 }
 0x1e9   :  { %v550_v12 = vadd.f32 %v1682_v33, %v549_v11  ;;  %v1361_v13 = vpop.f32.mrb[42].mxu1  ;;  %1402 = vmatprep.mubr.bf16.mxu0 %v622_v8 }
 0x1ea   :  { %v561_v14 = vadd.f32 %v1361_v13, %v1682_v33  ;;  %v552_v15 = vpop.f32.mrb[43].mxu1  ;;  %1403 = vmatmul.mubr.bf16.gmra.mrb[36].mxu0 %v623_v7  ;;  %v606_v17 = vmax.f32 %v558_v10, 0.0 }
 0x1eb   :  { %v553_v16 = vadd.f32 %v1682_v33, %v552_v15  ;;  %v604_v19 = vmax.f32 %v550_v12, 0.0 }
 0x1ec   :  { %v607_v18 = vmax.f32 %v561_v14, 0.0 }
 0x1ed   :  { %v605_v20 = vmax.f32 %v553_v16, 0.0 }
 0x1ee   :  { %v625_v21 = vpack.c.bf16 %v607_v18, %v606_v17 }
 0x1ef   :  { %v624_v22 = vpack.c.bf16 %v605_v20, %v604_v19  ;;  %v1364_v23 = vpop.f32.mrb[44].mxu1 }
 0x1f0   :  { %v574_v24 = vadd.f32 %v1364_v23, %v1682_v33  ;;  %v565_v25 = vpop.f32.mrb[45].mxu1 }
 0x1f1   :  { %v566_v26 = vadd.f32 %v1682_v33, %v565_v25  ;;  %v1365_v27 = vpop.f32.mrb[46].mxu1  ;;  %1406 = vmatprep.mubr.bf16.mxu0 %v624_v22 }
 0x1f2   :  { %v577_v28 = vadd.f32 %v1365_v27, %v1682_v33  ;;  %v568_v29 = vpop.f32.mrb[47].mxu1  ;;  %1407 = vmatmul.mubr.bf16.gmra.mrb[40].mxu0 %v625_v21  ;;  %v610_v31 = vmax.f32 %v574_v24, 0.0 }
 0x1f3   :  { %v569_v30 = vadd.f32 %v1682_v33, %v568_v29  ;;  %v608_v34 = vmax.f32 %v566_v26, 0.0 }
 0x1f4   :  { %v611_v32 = vmax.f32 %v577_v28, 0.0 }
 0x1f5   :  { %v609_v36 = vmax.f32 %v569_v30, 0.0 }
 0x1f6   :  { %v627_v37 = vpack.c.bf16 %v611_v32, %v610_v31 }
 0x1f7   :  { %v626_v38 = vpack.c.bf16 %v609_v36, %v608_v34 }
 0x1f9   :  { %1410 = vmatprep.mubr.bf16.mxu0 %v626_v38 }
 0x1fa   :  { %1411 = vmatmul.mubr.bf16.gmra.mrb[44].mxu0 %v627_v37 }
 0x295   :  { %v1384_v39 = vpop.f32.mrb[16].mxu0 }
 0x296   :  { %v733_v41 = vpop.f32.mrb[17].mxu0  ;;  %v742_v43 = vadd.f32 %v1384_v39, %v1719_v40 }
 0x297   :  { %v1385_v42 = vpop.f32.mrb[18].mxu0  ;;  %v734_v45 = vadd.f32 %v1719_v40, %v733_v41 }
 0x298   :  { %v745_v33 = vadd.f32 %v1385_v42, %v1719_v40  ;;  %v736_v44 = vpop.f32.mrb[19].mxu0 }
 0x299   :  { %v737_v46 = vadd.f32 %v1719_v40, %v736_v44 }
 0x29a   :  { %v1132_v47 = vpack.c.bf16 %v745_v33, %v742_v43 }
 0x29b   :  { %v1127_v48 = vpack.c.bf16 %v737_v46, %v734_v45 }
 0x29c   :  { %1204 = vst [vmem:[%s1808_s7 + $0x8] sm:$0xff] %v1132_v47  }
 0x29d   :  { %1128 = vst [vmem:[%s1808_s7] sm:$0xff] %v1127_v48   ;;  %v1388_v49 = vpop.f32.mrb[20].mxu0 }
 0x29e   :  { %v749_v50 = vpop.f32.mrb[21].mxu0  ;;  %v758_v51 = vadd.f32 %v1388_v49, %v1719_v40 }
 0x29f   :  { %v1389_v63 = vpop.f32.mrb[22].mxu0  ;;  %v750_v53 = vadd.f32 %v1719_v40, %v749_v50 }
 0x2a0   :  { %v761_v35 = vadd.f32 %v1389_v63, %v1719_v40  ;;  %v752_v52 = vpop.f32.mrb[23].mxu0 }
 0x2a1   :  { %v753_v54 = vadd.f32 %v1719_v40, %v752_v52 }
 0x2a2   :  { %v1142_v55 = vpack.c.bf16 %v761_v35, %v758_v51 }
 0x2a3   :  { %v1137_v56 = vpack.c.bf16 %v753_v54, %v750_v53 }
 0x2a4   :  { %1206 = vst [vmem:[%s1808_s7 + $0x18] sm:$0xff] %v1142_v55  }
 0x2a5   :  { %1205 = vst [vmem:[%s1808_s7 + $0x10] sm:$0xff] %v1137_v56   ;;  %v1392_v57 = vpop.f32.mrb[24].mxu0 }
 0x2a6   :  { %v765_v58 = vpop.f32.mrb[25].mxu0  ;;  %v774_v60 = vadd.f32 %v1392_v57, %v1719_v40 }
 0x2a7   :  { %v1393_v59 = vpop.f32.mrb[26].mxu0  ;;  %v766_v0 = vadd.f32 %v1719_v40, %v765_v58 }
 0x2a8   :  { %v777_v61 = vadd.f32 %v1393_v59, %v1719_v40  ;;  %v768_v62 = vpop.f32.mrb[27].mxu0 }
 0x2a9   :  { %v769_v1 = vadd.f32 %v1719_v40, %v768_v62 }
 0x2aa   :  { %v1152_v2 = vpack.c.bf16 %v777_v61, %v774_v60 }
 0x2ab   :  { %v1147_v3 = vpack.c.bf16 %v769_v1, %v766_v0 }
 0x2ac   :  { %1208 = vst [vmem:[%s1808_s7 + $0x28] sm:$0xff] %v1152_v2  }
 0x2ad   :  { %1207 = vst [vmem:[%s1808_s7 + $0x20] sm:$0xff] %v1147_v3   ;;  %v1396_v4 = vpop.f32.mrb[28].mxu0 }
 0x2ae   :  { %v781_v5 = vpop.f32.mrb[29].mxu0  ;;  %v790_v7 = vadd.f32 %v1396_v4, %v1719_v40 }
 0x2af   :  { %v1397_v6 = vpop.f32.mrb[30].mxu0  ;;  %v782_v10 = vadd.f32 %v1719_v40, %v781_v5 }
 0x2b0   :  { %v793_v8 = vadd.f32 %v1397_v6, %v1719_v40  ;;  %v784_v9 = vpop.f32.mrb[31].mxu0 }
 0x2b1   :  { %v785_v11 = vadd.f32 %v1719_v40, %v784_v9 }
 0x2b2   :  { %v1162_v12 = vpack.c.bf16 %v793_v8, %v790_v7 }
 0x2b3   :  { %v1157_v13 = vpack.c.bf16 %v785_v11, %v782_v10 }
 0x2b4   :  { %1210 = vst [vmem:[%s1808_s7 + $0x38] sm:$0xff] %v1162_v12  }
 0x2b5   :  { %1209 = vst [vmem:[%s1808_s7 + $0x30] sm:$0xff] %v1157_v13   ;;  %v1400_v14 = vpop.f32.mrb[32].mxu0 }
 0x2b6   :  { %v797_v15 = vpop.f32.mrb[33].mxu0  ;;  %v806_v17 = vadd.f32 %v1400_v14, %v1719_v40 }
 0x2b7   :  { %v1401_v16 = vpop.f32.mrb[34].mxu0  ;;  %v798_v20 = vadd.f32 %v1719_v40, %v797_v15 }
 0x2b8   :  { %v809_v18 = vadd.f32 %v1401_v16, %v1719_v40  ;;  %v800_v19 = vpop.f32.mrb[35].mxu0 }
 0x2b9   :  { %v801_v21 = vadd.f32 %v1719_v40, %v800_v19 }
 0x2ba   :  { %v1172_v22 = vpack.c.bf16 %v809_v18, %v806_v17 }
 0x2bb   :  { %v1167_v23 = vpack.c.bf16 %v801_v21, %v798_v20 }
 0x2bc   :  { %1212 = vst [vmem:[%s1808_s7 + $0x48] sm:$0xff] %v1172_v22  }
 0x2bd   :  { %1211 = vst [vmem:[%s1808_s7 + $0x40] sm:$0xff] %v1167_v23   ;;  %v1404_v24 = vpop.f32.mrb[36].mxu0 }
 0x2be   :  { %v813_v25 = vpop.f32.mrb[37].mxu0  ;;  %v822_v27 = vadd.f32 %v1404_v24, %v1719_v40 }
 0x2bf   :  { %v1405_v26 = vpop.f32.mrb[38].mxu0  ;;  %v814_v30 = vadd.f32 %v1719_v40, %v813_v25 }
 0x2c0   :  { %v825_v28 = vadd.f32 %v1405_v26, %v1719_v40  ;;  %v816_v29 = vpop.f32.mrb[39].mxu0 }
 0x2c1   :  { %v817_v31 = vadd.f32 %v1719_v40, %v816_v29 }
 0x2c2   :  { %v1182_v32 = vpack.c.bf16 %v825_v28, %v822_v27 }
 0x2c3   :  { %v1177_v34 = vpack.c.bf16 %v817_v31, %v814_v30 }
 0x2c4   :  { %1214 = vst [vmem:[%s1808_s7 + $0x58] sm:$0xff] %v1182_v32  }
 0x2c5   :  { %1213 = vst [vmem:[%s1808_s7 + $0x50] sm:$0xff] %v1177_v34   ;;  %v1408_v36 = vpop.f32.mrb[40].mxu0 }
 0x2c6   :  { %v829_v37 = vpop.f32.mrb[41].mxu0  ;;  %v838_v39 = vadd.f32 %v1408_v36, %v1719_v40 }
 0x2c7   :  { %v1409_v38 = vpop.f32.mrb[42].mxu0  ;;  %v830_v43 = vadd.f32 %v1719_v40, %v829_v37 }
 0x2c8   :  { %v841_v41 = vadd.f32 %v1409_v38, %v1719_v40  ;;  %v832_v42 = vpop.f32.mrb[43].mxu0 }
 0x2c9   :  { %v833_v33 = vadd.f32 %v1719_v40, %v832_v42 }
 0x2ca   :  { %v1192_v44 = vpack.c.bf16 %v841_v41, %v838_v39 }
 0x2cb   :  { %v1187_v45 = vpack.c.bf16 %v833_v33, %v830_v43 }
 0x2cc   :  { %1216 = vst [vmem:[%s1808_s7 + $0x68] sm:$0xff] %v1192_v44  }
 0x2cd   :  { %1215 = vst [vmem:[%s1808_s7 + $0x60] sm:$0xff] %v1187_v45   ;;  %v1412_v46 = vpop.f32.mrb[44].mxu0 }
 0x2ce   :  { %v845_v47 = vpop.f32.mrb[45].mxu0  ;;  %v854_v49 = vadd.f32 %v1412_v46, %v1719_v40 }
 0x2cf   :  { %v1413_v48 = vpop.f32.mrb[46].mxu0  ;;  %v846_v51 = vadd.f32 %v1719_v40, %v845_v47 }
 0x2d0   :  { %v857_v50 = vadd.f32 %v1413_v48, %v1719_v40  ;;  %v848_v63 = vpop.f32.mrb[47].mxu0 }
 0x2d1   :  { %v849_v35 = vadd.f32 %v1719_v40, %v848_v63 }
 0x2d2   :  { %v1202_v52 = vpack.c.bf16 %v857_v50, %v854_v49 }
 0x2d3   :  { %v1197_v53 = vpack.c.bf16 %v849_v35, %v846_v51 }
 0x2d4   :  { %1218 = vst [vmem:[%s1808_s7 + $0x78] sm:$0xff] %v1202_v52  }
 0x2d5   :  { %1217 = vst [vmem:[%s1808_s7 + $0x70] sm:$0xff] %v1197_v53  }

</bundles_post_ra>
